<compile_context>
chip_gen: v5e
topology: v5e:2x2
jax: 0.10.0
libtpu: 0.0.40
codegen_flags: <defaults>
</compile_context>

<pallas_src>
import functools

import jax
import jax.numpy as jnp
from jax import lax
from jax.experimental import pallas as pl
from jax.experimental.pallas import tpu as pltpu

_SUBLANE = 8    # f32 sublane packing
_LANE = 128     # lane width


def _round_up(n, m):
    return ((n + m - 1) // m) * m


# ----------------------------- Pallas kernel --------------------------------

def _tcn_kernel(*refs, blocks, Lp, Bc, valid_len, pool_size, use_bf16):
    """Whole TCN forward for one batch chunk.

    refs = [x_ref] + per-block [w1, b1, w2, b2, (wd, bd)] + [o_ref]
      x_ref : (cin0_p, Bc*Lp)      channels on sublanes, batch folded into lanes
      wX    : (cout_p, K*cin_p)    pre-packed; tap k occupies columns [k*cin_p, ...)
      bX    : (cout_p, 1)
      o_ref : (Bc, cout_last_p, pool_pad)
    """
    x_ref = refs[0]
    o_ref = refs[-1]
    w_refs = refs[1:-1]

    n_lanes = Bc * Lp

    # Hoisted per-batch lane position & causal keep-masks, shared by every conv
    # of every block (JAX does not CSE broadcast/iota).
    pos = lax.broadcasted_iota(jnp.int32, (1, n_lanes), 1) % Lp
    shift_set = sorted({(blk["K"] - 1 - k) * blk["dilation"]
                        for blk in blocks for k in range(blk["K"])})
    keep = {s: (pos >= s) for s in shift_set if 0 < s < Lp}

    def stack_taps(h, K, dilation):
        # (C, n_lanes) -> (K*C, n_lanes); row-block k = h shifted right by
        # (K-1-k)*dilation within each batch's Lp window, causally zero-filled.
        if K == 1:
            return h
        taps = []
        for k in range(K):
            s = (K - 1 - k) * dilation
            if s == 0:
                taps.append(h)
            elif s >= Lp:
                taps.append(jnp.zeros_like(h))      # tap fully outside the window
            else:
                rolled = pltpu.roll(h, s, 1)        # out[:, t] = h[:, (t - s) mod n_lanes]
                taps.append(jnp.where(keep[s], rolled, 0.0))
        return jnp.concatenate(taps, axis=0)

    def mxu(w_ref, rhs):
        lhs = w_ref[...]
        if use_bf16:                                # cast only at the MXU boundary
            lhs = lhs.astype(jnp.bfloat16)
            rhs = rhs.astype(jnp.bfloat16)
        return jnp.dot(lhs, rhs, preferred_element_type=jnp.float32)

    h = x_ref[...].astype(jnp.float32)              # (cin0_p, n_lanes)
    wi = 0
    for blk in blocks:
        K, d = blk["K"], blk["dilation"]
        w1, b1, w2, b2 = w_refs[wi], w_refs[wi + 1], w_refs[wi + 2], w_refs[wi + 3]
        wi += 4
        h1 = jnp.maximum(mxu(w1, stack_taps(h, K, d)) + b1[...], 0.0)
        h2 = jnp.maximum(mxu(w2, stack_taps(h1, K, d)) + b2[...], 0.0)
        if blk["has_downsample"]:
            wd, bd = w_refs[wi], w_refs[wi + 1]
            wi += 2
            res = mxu(wd, h) + bd[...]
        else:
            res = h                                 # cin_p == cout_p (asserted at pack time)
        h = jnp.maximum(h2 + res, 0.0)              # (cout_p, n_lanes), stays in VMEM

    # Fused AdaptiveMaxPool1d over the valid prefix [0, valid_len) of each batch.
    # Bins are never empty for valid_len >= 1: ceil((i+1)L/S) - floor(iL/S) >= 1.
    cout_p = h.shape[0]
    pool_pad = o_ref.shape[-1]
    for b in range(Bc):                             # Bc, pool_size are static & small
        cols = []
        for i in range(pool_size):
            s = (i * valid_len) // pool_size
            e = -(-((i + 1) * valid_len) // pool_size)   # ceil
            cols.append(jnp.max(h[:, b * Lp + s: b * Lp + e], axis=-1, keepdims=True))
        pooled = jnp.concatenate(cols, axis=-1)          # (cout_p, pool_size)
        if pool_pad > pool_size:                         # pad lanes -> unmasked full-tile store
            pooled = jnp.concatenate(
                [pooled, jnp.zeros((cout_p, pool_pad - pool_size), pooled.dtype)], axis=-1)
        o_ref[b] = pooled.astype(o_ref.dtype)


# ------------------------------ JAX wrappers ---------------------------------

def init_tcn_params(key, num_inputs, num_channels, kernel_size):
    params = []
    for i, c_out in enumerate(num_channels):
        c_in = num_inputs if i == 0 else num_channels[i - 1]
        key, k1, k2, k3, k4, k5, k6 = jax.random.split(key, 7)
        blk = {
            "w1": 0.1 * jax.random.normal(k1, (c_out, c_in, kernel_size), jnp.float32),
            "b1": 0.1 * jax.random.normal(k2, (c_out,), jnp.float32),
            "w2": 0.1 * jax.random.normal(k3, (c_out, c_out, kernel_size), jnp.float32),
            "b2": 0.1 * jax.random.normal(k4, (c_out,), jnp.float32),
        }
        if c_in != c_out:  # 1x1 downsample conv on the residual path
            blk["wd"] = 0.1 * jax.random.normal(k5, (c_out, c_in, 1), jnp.float32)
            blk["bd"] = 0.1 * jax.random.normal(k6, (c_out,), jnp.float32)
        params.append(blk)
    return params


def _pack_conv_weight(w, cout_p, cin_p):
    # torch layout (C_out, C_in, K) -> (cout_p, K*cin_p); tap k occupies
    # columns [k*cin_p, k*cin_p + C_in).
    C_out, C_in, K = w.shape
    wp = jnp.zeros((cout_p, K * cin_p), w.dtype)
    for k in range(K):
        wp = wp.at[:C_out, k * cin_p:k * cin_p + C_in].set(w[:, :, k])
    return wp


def _pack_bias(b, cout_p):
    return jnp.zeros((cout_p, 1), b.dtype).at[: b.shape[0], 0].set(b)


def pack_tcn_params(params):
    """Pad channels to sublane multiples and pre-pack weights for one-shot MXU contraction."""
    packed = []
    for blk in params:
        c_out, c_in, K = blk["w1"].shape
        cin_p = _round_up(c_in, _SUBLANE)
        cout_p = _round_up(c_out, _SUBLANE)
        if "wd" not in blk:
            assert cin_p == cout_p, "identity residual requires equal padded channel counts"
        pb = {
            "K": K, "c_out": c_out, "cin_p": cin_p, "cout_p": cout_p,
            "w1": _pack_conv_weight(blk["w1"], cout_p, cin_p),
            "b1": _pack_bias(blk["b1"], cout_p),
            "w2": _pack_conv_weight(blk["w2"], cout_p, cout_p),
            "b2": _pack_bias(blk["b2"], cout_p),
        }
        if "wd" in blk:
            pb["wd"] = _pack_conv_weight(blk["wd"], cout_p, cin_p)   # (cout_p, cin_p)
            pb["bd"] = _pack_bias(blk["bd"], cout_p)
        packed.append(pb)
    return packed


def tcn_forward(packed_params, x, adaptive_size, *, max_batch_chunk=8, use_bf16_mxu=False):
    """Whole TCN (all TemporalBlocks + AdaptiveMaxPool1d) as ONE pallas_call."""
    B, C_in, L = x.shape
    assert L >= 1 and adaptive_size >= 1
    Lp = _round_up(L, _LANE)
    Bc = min(max_batch_chunk, B)            # batch chunk folded into the lane dim
    n_chunks = -(-B // Bc)
    B_pad = n_chunks * Bc
    cin0_p = packed_params[0]["cin_p"]
    cout_last = packed_params[-1]["c_out"]
    cout_last_p = packed_params[-1]["cout_p"]
    pool_pad = _round_up(adaptive_size, _LANE)

    # (B, C, L) -> (cin0_p, B_pad*Lp): channels on sublanes, batch folded into lanes.
    # Zero padding is safe: causal convs never look forward, padded channel rows stay
    # exactly zero, and the cross-batch wrap of pltpu.roll is masked in-kernel.
    xp = jnp.zeros((B_pad, cin0_p, Lp), jnp.float32).at[:B, :C_in, :L].set(x)
    x2d = jnp.transpose(xp, (1, 0, 2)).reshape(cin0_p, B_pad * Lp)

    blocks = []
    args = [x2d]
    in_specs = [pl.BlockSpec((cin0_p, Bc * Lp), lambda c: (0, c))]
    weight_bytes = 0
    for i, blk in enumerate(packed_params):
        blocks.append(dict(K=blk["K"], dilation=2 ** i, has_downsample="wd" in blk,
                           cin_p=blk["cin_p"], cout_p=blk["cout_p"]))
        names = ("w1", "b1", "w2", "b2") + (("wd", "bd") if "wd" in blk else ())
        for name in names:
            w = blk[name]
            args.append(w)
            in_specs.append(pl.BlockSpec(w.shape, lambda c: (0, 0)))
            weight_bytes += w.size * w.dtype.itemsize

    # ---- cost & scoped-VMEM estimates (explicit limit with headroom) ----
    n_lanes_total = B_pad * Lp
    n_lanes_chunk = Bc * Lp
    flops = 0
    live_bytes = 0
    for m in blocks:
        K, ci, co = m["K"], m["cin_p"], m["cout_p"]
        flops += 2 * co * (K * ci) * n_lanes_total + 2 * co * (K * co) * n_lanes_total
        if m["has_downsample"]:
            flops += 2 * co * ci * n_lanes_total
        live_bytes += (K * ci + K * co + 4 * co + ci) * n_lanes_chunk * 4
    out_bytes = B_pad * cout_last_p * pool_pad * 4
    cost = pl.CostEstimate(flops=flops, transcendentals=0,
                           bytes_accessed=x2d.size * 4 + weight_bytes + out_bytes)
    vmem_need = (2 * cin0_p * n_lanes_chunk * 4            # double-buffered input block
                 + 2 * Bc * cout_last_p * pool_pad * 4     # double-buffered output block
                 + 2 * weight_bytes
                 + live_bytes)                             # in-kernel live intermediates
    vmem_limit = int(min(64 * 2 ** 20, max(16 * 2 ** 20, 2 * vmem_need)))

    kern = functools.partial(
        _tcn_kernel, blocks=blocks, Lp=Lp, Bc=Bc, valid_len=L,
        pool_size=adaptive_size, use_bf16=use_bf16_mxu)

    out = pl.pallas_call(
        kern,
        out_shape=jax.ShapeDtypeStruct((B_pad, cout_last_p, pool_pad), jnp.float32),
        grid=(n_chunks,),
        in_specs=in_specs,
        out_specs=pl.BlockSpec((Bc, cout_last_p, pool_pad), lambda c: (c, 0, 0)),
        compiler_params=pltpu.CompilerParams(
            dimension_semantics=("parallel",),
            vmem_limit_bytes=vmem_limit),
        cost_estimate=cost,
    )(*args)

    return out[:B, :cout_last, :adaptive_size]


# --------------------------- pure-JAX reference ------------------------------

def _ref_causal_conv(x, w, b, d):
    K = w.shape[-1]
    p = (K - 1) * d
    out = lax.conv_general_dilated(
        x, w, window_strides=(1,), padding=[(p, 0)],
        rhs_dilation=(d,), dimension_numbers=("NCH", "OIH", "NCH"))
    return out + b[None, :, None]


def ref_tcn(params, x, adaptive_size):
    h = x
    for i, blk in enumerate(params):
        d = 2 ** i
        h1 = jax.nn.relu(_ref_causal_conv(h, blk["w1"], blk["b1"], d))
        h2 = jax.nn.relu(_ref_causal_conv(h1, blk["w2"], blk["b2"], d))
        res = h if "wd" not in blk else _ref_causal_conv(h, blk["wd"], blk["bd"], 1)
        h = jax.nn.relu(h2 + res)
    B, C, L = h.shape
    S = adaptive_size
    cols = []
    for i in range(S):
        s = (i * L) // S
        e = -(-((i + 1) * L) // S)
        cols.append(jnp.max(h[:, :, s:e], axis=-1, keepdims=True))
    return jnp.concatenate(cols, axis=-1)


if __name__ == "__main__":
    B, num_inputs, L = 2, 4, 16
    num_channels = [8, 8]
    adaptive_size = 4
    kernel_size = 2

    key = jax.random.PRNGKey(0)
    kx, kp = jax.random.split(key)
    x = jax.random.normal(kx, (B, num_inputs, L), jnp.float32)
    params = init_tcn_params(kp, num_inputs, num_channels, kernel_size)
    packed = pack_tcn_params(params)

    ref = ref_tcn(params, x, adaptive_size)

    # f32 path (all generations)
    out = jax.block_until_ready(tcn_forward(packed, x, adaptive_size))
    assert out.shape == (B, num_channels[-1], adaptive_size), out.shape
    assert jnp.allclose(out, ref, atol=5e-4, rtol=5e-4), "f32 path mismatch vs reference"

    # bf16 MXU fast path (v6e/v7x lever; elementwise stays f32 for v5e compatibility)
    out_bf16 = jax.block_until_ready(
        tcn_forward(packed, x, adaptive_size, use_bf16_mxu=True))
    assert jnp.allclose(out_bf16, ref, atol=5e-2, rtol=5e-2), "bf16 path mismatch vs reference"

    print("KERNEL_OK")
</pallas_src>

<mosaic_0001>
module attributes {stable_mosaic.version = 11 : i64} {
  func.func @_tcn_kernel(%arg0: i32, %arg1: memref<8x256xf32, #tpu.memory_space<vmem>>, %arg2: memref<8x16xf32, #tpu.memory_space<vmem>>, %arg3: memref<8x1xf32, #tpu.memory_space<vmem>>, %arg4: memref<8x16xf32, #tpu.memory_space<vmem>>, %arg5: memref<8x1xf32, #tpu.memory_space<vmem>>, %arg6: memref<8x8xf32, #tpu.memory_space<vmem>>, %arg7: memref<8x1xf32, #tpu.memory_space<vmem>>, %arg8: memref<8x16xf32, #tpu.memory_space<vmem>>, %arg9: memref<8x1xf32, #tpu.memory_space<vmem>>, %arg10: memref<8x16xf32, #tpu.memory_space<vmem>>, %arg11: memref<8x1xf32, #tpu.memory_space<vmem>>, %arg12: memref<2x8x128xf32, #tpu.memory_space<vmem>>) attributes {dimension_semantics = [#tpu.dimension_semantics<parallel>], iteration_bounds = array<i64: 1>, scalar_prefetch = 0 : i64, scratch_operands = 0 : i64, tpu.core_type = #tpu.core_type<tc>, window_params = [{transform_indices = @transform_0, window_bounds = array<i64: 8, 256>}, {pipeline_mode = #tpu.pipeline_mode<synchronous>, transform_indices = @transform_1, window_bounds = array<i64: 8, 16>}, {pipeline_mode = #tpu.pipeline_mode<synchronous>, transform_indices = @transform_2, window_bounds = array<i64: 8, 1>}, {pipeline_mode = #tpu.pipeline_mode<synchronous>, transform_indices = @transform_3, window_bounds = array<i64: 8, 16>}, {pipeline_mode = #tpu.pipeline_mode<synchronous>, transform_indices = @transform_4, window_bounds = array<i64: 8, 1>}, {pipeline_mode = #tpu.pipeline_mode<synchronous>, transform_indices = @transform_5, window_bounds = array<i64: 8, 8>}, {pipeline_mode = #tpu.pipeline_mode<synchronous>, transform_indices = @transform_6, window_bounds = array<i64: 8, 1>}, {pipeline_mode = #tpu.pipeline_mode<synchronous>, transform_indices = @transform_7, window_bounds = array<i64: 8, 16>}, {pipeline_mode = #tpu.pipeline_mode<synchronous>, transform_indices = @transform_8, window_bounds = array<i64: 8, 1>}, {pipeline_mode = #tpu.pipeline_mode<synchronous>, transform_indices = @transform_9, window_bounds = array<i64: 8, 16>}, {pipeline_mode = #tpu.pipeline_mode<synchronous>, transform_indices = @transform_10, window_bounds = array<i64: 8, 1>}, {transform_indices = @transform_11, window_bounds = array<i64: 2, 8, 128>}]} {
    %0 = tpu.iota {dimensions = array<i32: 1>} : vector<1x256xi32>
    %c128_i32 = arith.constant 128 : i32
    %c0_i32 = arith.constant 0 : i32
    %1 = arith.cmpi eq, %c128_i32, %c0_i32 : i32
    %c1_i32 = arith.constant 1 : i32
    %2 = arith.select %1, %c1_i32, %c128_i32 : i32
    %3 = vector.broadcast %2 : i32 to vector<1x256xi32>
    %4 = arith.remsi %0, %3 : vector<1x256xi32>
    %c0_i32_0 = arith.constant 0 : i32
    %5 = vector.broadcast %c0_i32_0 : i32 to vector<1x256xi32>
    %6 = arith.cmpi ne, %4, %5 : vector<1x256xi32>
    %c0_i32_1 = arith.constant 0 : i32
    %7 = vector.broadcast %c0_i32_1 : i32 to vector<1x256xi32>
    %8 = arith.cmpi slt, %4, %7 : vector<1x256xi32>
    %c0_i32_2 = arith.constant 0 : i32
    %9 = arith.cmpi slt, %2, %c0_i32_2 : i32
    %10 = vector.broadcast %9 : i1 to vector<1x256xi1>
    %11 = vector.broadcast %10 : vector<1x256xi1> to vector<1x256xi1>
    %12 = arith.xori %8, %11 : vector<1x256xi1>
    %13 = arith.andi %12, %6 : vector<1x256xi1>
    %14 = vector.broadcast %2 : i32 to vector<1x256xi32>
    %15 = arith.addi %4, %14 : vector<1x256xi32>
    %16 = arith.select %13, %15, %4 : vector<1x256xi1>, vector<1x256xi32>
    %c1_i32_3 = arith.constant 1 : i32
    %17 = vector.broadcast %c1_i32_3 : i32 to vector<1x256xi32>
    %18 = arith.cmpi sge, %16, %17 : vector<1x256xi32>
    %c2_i32 = arith.constant 2 : i32
    %19 = vector.broadcast %c2_i32 : i32 to vector<1x256xi32>
    %20 = arith.cmpi sge, %16, %19 : vector<1x256xi32>
    %c0 = arith.constant 0 : index
    %c0_4 = arith.constant 0 : index
    %21 = vector.load %arg1[%c0, %c0_4] : memref<8x256xf32, #tpu.memory_space<vmem>>, vector<8x256xf32>
    %c1_i32_5 = arith.constant 1 : i32
    %22 = tpu.dynamic_rotate %21 by %c1_i32_5 dim 1 : vector<8x256xf32>, i32 -> vector<8x256xf32>
    %cst = arith.constant 0.000000e+00 : f32
    %23 = vector.shape_cast %18 : vector<1x256xi1> to vector<1x256xi1>
    %24 = vector.broadcast %23 : vector<1x256xi1> to vector<8x256xi1>
    %25 = vector.broadcast %cst : f32 to vector<8x256xf32>
    %26 = arith.select %24, %22, %25 : vector<8x256xi1>, vector<8x256xf32>
    %27 = tpu.concatenate %26, %21 in 0 : vector<8x256xf32>, vector<8x256xf32> -> vector<16x256xf32>
    %c0_6 = arith.constant 0 : index
    %c0_7 = arith.constant 0 : index
    %28 = vector.load %arg2[%c0_6, %c0_7] : memref<8x16xf32, #tpu.memory_space<vmem>>, vector<8x16xf32>
    %cst_8 = arith.constant dense<0.000000e+00> : vector<8x256xf32>
    %29 = tpu.matmul %28, %27, %cst_8 {dimension_numbers = #tpu.dot_dimension_numbers<[1], [0], [0], [1], [0, 0, 1, 1], [], []>} : vector<8x16xf32>, vector<16x256xf32>, vector<8x256xf32> -> vector<8x256xf32>
    %c0_9 = arith.constant 0 : index
    %c0_10 = arith.constant 0 : index
    %30 = vector.load %arg3[%c0_9, %c0_10] : memref<8x1xf32, #tpu.memory_space<vmem>>, vector<8x1xf32>
    %31 = vector.broadcast %30 : vector<8x1xf32> to vector<8x256xf32>
    %32 = arith.addf %29, %31 : vector<8x256xf32>
    %cst_11 = arith.constant 0.000000e+00 : f32
    %33 = vector.broadcast %cst_11 : f32 to vector<8x256xf32>
    %34 = arith.maximumf %32, %33 : vector<8x256xf32>
    %c1_i32_12 = arith.constant 1 : i32
    %35 = tpu.dynamic_rotate %34 by %c1_i32_12 dim 1 : vector<8x256xf32>, i32 -> vector<8x256xf32>
    %cst_13 = arith.constant 0.000000e+00 : f32
    %36 = vector.shape_cast %18 : vector<1x256xi1> to vector<1x256xi1>
    %37 = vector.broadcast %36 : vector<1x256xi1> to vector<8x256xi1>
    %38 = vector.broadcast %cst_13 : f32 to vector<8x256xf32>
    %39 = arith.select %37, %35, %38 : vector<8x256xi1>, vector<8x256xf32>
    %40 = tpu.concatenate %39, %34 in 0 : vector<8x256xf32>, vector<8x256xf32> -> vector<16x256xf32>
    %c0_14 = arith.constant 0 : index
    %c0_15 = arith.constant 0 : index
    %41 = vector.load %arg4[%c0_14, %c0_15] : memref<8x16xf32, #tpu.memory_space<vmem>>, vector<8x16xf32>
    %cst_16 = arith.constant dense<0.000000e+00> : vector<8x256xf32>
    %42 = tpu.matmul %41, %40, %cst_16 {dimension_numbers = #tpu.dot_dimension_numbers<[1], [0], [0], [1], [0, 0, 1, 1], [], []>} : vector<8x16xf32>, vector<16x256xf32>, vector<8x256xf32> -> vector<8x256xf32>
    %c0_17 = arith.constant 0 : index
    %c0_18 = arith.constant 0 : index
    %43 = vector.load %arg5[%c0_17, %c0_18] : memref<8x1xf32, #tpu.memory_space<vmem>>, vector<8x1xf32>
    %44 = vector.broadcast %43 : vector<8x1xf32> to vector<8x256xf32>
    %45 = arith.addf %42, %44 : vector<8x256xf32>
    %cst_19 = arith.constant 0.000000e+00 : f32
    %46 = vector.broadcast %cst_19 : f32 to vector<8x256xf32>
    %47 = arith.maximumf %45, %46 : vector<8x256xf32>
    %c0_20 = arith.constant 0 : index
    %c0_21 = arith.constant 0 : index
    %48 = vector.load %arg6[%c0_20, %c0_21] : memref<8x8xf32, #tpu.memory_space<vmem>>, vector<8x8xf32>
    %cst_22 = arith.constant dense<0.000000e+00> : vector<8x256xf32>
    %49 = tpu.matmul %48, %21, %cst_22 {dimension_numbers = #tpu.dot_dimension_numbers<[1], [0], [0], [1], [0, 0, 1, 1], [], []>} : vector<8x8xf32>, vector<8x256xf32>, vector<8x256xf32> -> vector<8x256xf32>
    %c0_23 = arith.constant 0 : index
    %c0_24 = arith.constant 0 : index
    %50 = vector.load %arg7[%c0_23, %c0_24] : memref<8x1xf32, #tpu.memory_space<vmem>>, vector<8x1xf32>
    %51 = vector.broadcast %50 : vector<8x1xf32> to vector<8x256xf32>
    %52 = arith.addf %49, %51 : vector<8x256xf32>
    %53 = arith.addf %47, %52 : vector<8x256xf32>
    %cst_25 = arith.constant 0.000000e+00 : f32
    %54 = vector.broadcast %cst_25 : f32 to vector<8x256xf32>
    %55 = arith.maximumf %53, %54 : vector<8x256xf32>
    %c2_i32_26 = arith.constant 2 : i32
    %56 = tpu.dynamic_rotate %55 by %c2_i32_26 dim 1 : vector<8x256xf32>, i32 -> vector<8x256xf32>
    %cst_27 = arith.constant 0.000000e+00 : f32
    %57 = vector.shape_cast %20 : vector<1x256xi1> to vector<1x256xi1>
    %58 = vector.broadcast %57 : vector<1x256xi1> to vector<8x256xi1>
    %59 = vector.broadcast %cst_27 : f32 to vector<8x256xf32>
    %60 = arith.select %58, %56, %59 : vector<8x256xi1>, vector<8x256xf32>
    %61 = tpu.concatenate %60, %55 in 0 : vector<8x256xf32>, vector<8x256xf32> -> vector<16x256xf32>
    %c0_28 = arith.constant 0 : index
    %c0_29 = arith.constant 0 : index
    %62 = vector.load %arg8[%c0_28, %c0_29] : memref<8x16xf32, #tpu.memory_space<vmem>>, vector<8x16xf32>
    %cst_30 = arith.constant dense<0.000000e+00> : vector<8x256xf32>
    %63 = tpu.matmul %62, %61, %cst_30 {dimension_numbers = #tpu.dot_dimension_numbers<[1], [0], [0], [1], [0, 0, 1, 1], [], []>} : vector<8x16xf32>, vector<16x256xf32>, vector<8x256xf32> -> vector<8x256xf32>
    %c0_31 = arith.constant 0 : index
    %c0_32 = arith.constant 0 : index
    %64 = vector.load %arg9[%c0_31, %c0_32] : memref<8x1xf32, #tpu.memory_space<vmem>>, vector<8x1xf32>
    %65 = vector.broadcast %64 : vector<8x1xf32> to vector<8x256xf32>
    %66 = arith.addf %63, %65 : vector<8x256xf32>
    %cst_33 = arith.constant 0.000000e+00 : f32
    %67 = vector.broadcast %cst_33 : f32 to vector<8x256xf32>
    %68 = arith.maximumf %66, %67 : vector<8x256xf32>
    %c2_i32_34 = arith.constant 2 : i32
    %69 = tpu.dynamic_rotate %68 by %c2_i32_34 dim 1 : vector<8x256xf32>, i32 -> vector<8x256xf32>
    %cst_35 = arith.constant 0.000000e+00 : f32
    %70 = vector.shape_cast %20 : vector<1x256xi1> to vector<1x256xi1>
    %71 = vector.broadcast %70 : vector<1x256xi1> to vector<8x256xi1>
    %72 = vector.broadcast %cst_35 : f32 to vector<8x256xf32>
    %73 = arith.select %71, %69, %72 : vector<8x256xi1>, vector<8x256xf32>
    %74 = tpu.concatenate %73, %68 in 0 : vector<8x256xf32>, vector<8x256xf32> -> vector<16x256xf32>
    %c0_36 = arith.constant 0 : index
    %c0_37 = arith.constant 0 : index
    %75 = vector.load %arg10[%c0_36, %c0_37] : memref<8x16xf32, #tpu.memory_space<vmem>>, vector<8x16xf32>
    %cst_38 = arith.constant dense<0.000000e+00> : vector<8x256xf32>
    %76 = tpu.matmul %75, %74, %cst_38 {dimension_numbers = #tpu.dot_dimension_numbers<[1], [0], [0], [1], [0, 0, 1, 1], [], []>} : vector<8x16xf32>, vector<16x256xf32>, vector<8x256xf32> -> vector<8x256xf32>
    %c0_39 = arith.constant 0 : index
    %c0_40 = arith.constant 0 : index
    %77 = vector.load %arg11[%c0_39, %c0_40] : memref<8x1xf32, #tpu.memory_space<vmem>>, vector<8x1xf32>
    %78 = vector.broadcast %77 : vector<8x1xf32> to vector<8x256xf32>
    %79 = arith.addf %76, %78 : vector<8x256xf32>
    %cst_41 = arith.constant 0.000000e+00 : f32
    %80 = vector.broadcast %cst_41 : f32 to vector<8x256xf32>
    %81 = arith.maximumf %79, %80 : vector<8x256xf32>
    %82 = arith.addf %81, %55 : vector<8x256xf32>
    %cst_42 = arith.constant 0.000000e+00 : f32
    %83 = vector.broadcast %cst_42 : f32 to vector<8x256xf32>
    %84 = arith.maximumf %82, %83 : vector<8x256xf32>
    %85 = vector.extract_strided_slice %84 {offsets = [0, 0], sizes = [8, 4], strides = [1, 1]} : vector<8x256xf32> to vector<8x4xf32>
    %cst_43 = arith.constant dense<0xFF800000> : vector<8xf32>
    %86 = vector.multi_reduction <maximumf>, %85, %cst_43 [1] : vector<8x4xf32> to vector<8xf32>
    %87 = vector.shape_cast %86 : vector<8xf32> to vector<8x1xf32>
    %88 = vector.extract_strided_slice %84 {offsets = [0, 4], sizes = [8, 4], strides = [1, 1]} : vector<8x256xf32> to vector<8x4xf32>
    %cst_44 = arith.constant dense<0xFF800000> : vector<8xf32>
    %89 = vector.multi_reduction <maximumf>, %88, %cst_44 [1] : vector<8x4xf32> to vector<8xf32>
    %90 = vector.shape_cast %89 : vector<8xf32> to vector<8x1xf32>
    %91 = vector.extract_strided_slice %84 {offsets = [0, 8], sizes = [8, 4], strides = [1, 1]} : vector<8x256xf32> to vector<8x4xf32>
    %cst_45 = arith.constant dense<0xFF800000> : vector<8xf32>
    %92 = vector.multi_reduction <maximumf>, %91, %cst_45 [1] : vector<8x4xf32> to vector<8xf32>
    %93 = vector.shape_cast %92 : vector<8xf32> to vector<8x1xf32>
    %94 = vector.extract_strided_slice %84 {offsets = [0, 12], sizes = [8, 4], strides = [1, 1]} : vector<8x256xf32> to vector<8x4xf32>
    %cst_46 = arith.constant dense<0xFF800000> : vector<8xf32>
    %95 = vector.multi_reduction <maximumf>, %94, %cst_46 [1] : vector<8x4xf32> to vector<8xf32>
    %96 = vector.shape_cast %95 : vector<8xf32> to vector<8x1xf32>
    %97 = tpu.concatenate %87, %90, %93, %96 in 1 : vector<8x1xf32>, vector<8x1xf32>, vector<8x1xf32>, vector<8x1xf32> -> vector<8x4xf32>
    %cst_47 = arith.constant 0.000000e+00 : f32
    %98 = vector.broadcast %cst_47 : f32 to vector<8x124xf32>
    %99 = tpu.concatenate %97, %98 in 1 : vector<8x4xf32>, vector<8x124xf32> -> vector<8x128xf32>
    %c0_48 = arith.constant 0 : index
    %c0_49 = arith.constant 0 : index
    %c0_50 = arith.constant 0 : index
    %100 = vector.load %arg12[%c0_48, %c0_49, %c0_50] : memref<2x8x128xf32, #tpu.memory_space<vmem>>, vector<1x8x128xf32>
    %101 = vector.shape_cast %100 : vector<1x8x128xf32> to vector<8x128xf32>
    %102 = vector.shape_cast %99 : vector<8x128xf32> to vector<1x8x128xf32>
    tpu.vector_store %arg12[%c0_48, %c0_49, %c0_50], %102 {strides = array<i32>} : memref<2x8x128xf32, #tpu.memory_space<vmem>>, vector<1x8x128xf32>,
    %103 = vector.extract_strided_slice %84 {offsets = [0, 128], sizes = [8, 4], strides = [1, 1]} : vector<8x256xf32> to vector<8x4xf32>
    %cst_51 = arith.constant dense<0xFF800000> : vector<8xf32>
    %104 = vector.multi_reduction <maximumf>, %103, %cst_51 [1] : vector<8x4xf32> to vector<8xf32>
    %105 = vector.shape_cast %104 : vector<8xf32> to vector<8x1xf32>
    %106 = vector.extract_strided_slice %84 {offsets = [0, 132], sizes = [8, 4], strides = [1, 1]} : vector<8x256xf32> to vector<8x4xf32>
    %cst_52 = arith.constant dense<0xFF800000> : vector<8xf32>
    %107 = vector.multi_reduction <maximumf>, %106, %cst_52 [1] : vector<8x4xf32> to vector<8xf32>
    %108 = vector.shape_cast %107 : vector<8xf32> to vector<8x1xf32>
    %109 = vector.extract_strided_slice %84 {offsets = [0, 136], sizes = [8, 4], strides = [1, 1]} : vector<8x256xf32> to vector<8x4xf32>
    %cst_53 = arith.constant dense<0xFF800000> : vector<8xf32>
    %110 = vector.multi_reduction <maximumf>, %109, %cst_53 [1] : vector<8x4xf32> to vector<8xf32>
    %111 = vector.shape_cast %110 : vector<8xf32> to vector<8x1xf32>
    %112 = vector.extract_strided_slice %84 {offsets = [0, 140], sizes = [8, 4], strides = [1, 1]} : vector<8x256xf32> to vector<8x4xf32>
    %cst_54 = arith.constant dense<0xFF800000> : vector<8xf32>
    %113 = vector.multi_reduction <maximumf>, %112, %cst_54 [1] : vector<8x4xf32> to vector<8xf32>
    %114 = vector.shape_cast %113 : vector<8xf32> to vector<8x1xf32>
    %115 = tpu.concatenate %105, %108, %111, %114 in 1 : vector<8x1xf32>, vector<8x1xf32>, vector<8x1xf32>, vector<8x1xf32> -> vector<8x4xf32>
    %cst_55 = arith.constant 0.000000e+00 : f32
    %116 = vector.broadcast %cst_55 : f32 to vector<8x124xf32>
    %117 = tpu.concatenate %115, %116 in 1 : vector<8x4xf32>, vector<8x124xf32> -> vector<8x128xf32>
    %c1 = arith.constant 1 : index
    %c0_56 = arith.constant 0 : index
    %c0_57 = arith.constant 0 : index
    %118 = vector.load %arg12[%c1, %c0_56, %c0_57] : memref<2x8x128xf32, #tpu.memory_space<vmem>>, vector<1x8x128xf32>
    %119 = vector.shape_cast %118 : vector<1x8x128xf32> to vector<8x128xf32>
    %120 = vector.shape_cast %117 : vector<8x128xf32> to vector<1x8x128xf32>
    tpu.vector_store %arg12[%c1, %c0_56, %c0_57], %120 {strides = array<i32>} : memref<2x8x128xf32, #tpu.memory_space<vmem>>, vector<1x8x128xf32>,
    return
  }
  func.func @transform_0(%arg0: i32) -> (i32, i32) {
    %c0_i32 = arith.constant 0 : i32
    %c0_i32_0 = arith.constant 0 : i32
    return %c0_i32, %arg0 : i32, i32
  }
  func.func @transform_1(%arg0: i32) -> (i32, i32) {
    %c0_i32 = arith.constant 0 : i32
    %c0_i32_0 = arith.constant 0 : i32
    %c0_i32_1 = arith.constant 0 : i32
    return %c0_i32, %c0_i32_0 : i32, i32
  }
  func.func @transform_2(%arg0: i32) -> (i32, i32) {
    %c0_i32 = arith.constant 0 : i32
    %c0_i32_0 = arith.constant 0 : i32
    %c0_i32_1 = arith.constant 0 : i32
    return %c0_i32, %c0_i32_0 : i32, i32
  }
  func.func @transform_3(%arg0: i32) -> (i32, i32) {
    %c0_i32 = arith.constant 0 : i32
    %c0_i32_0 = arith.constant 0 : i32
    %c0_i32_1 = arith.constant 0 : i32
    return %c0_i32, %c0_i32_0 : i32, i32
  }
  func.func @transform_4(%arg0: i32) -> (i32, i32) {
    %c0_i32 = arith.constant 0 : i32
    %c0_i32_0 = arith.constant 0 : i32
    %c0_i32_1 = arith.constant 0 : i32
    return %c0_i32, %c0_i32_0 : i32, i32
  }
  func.func @transform_5(%arg0: i32) -> (i32, i32) {
    %c0_i32 = arith.constant 0 : i32
    %c0_i32_0 = arith.constant 0 : i32
    %c0_i32_1 = arith.constant 0 : i32
    return %c0_i32, %c0_i32_0 : i32, i32
  }
  func.func @transform_6(%arg0: i32) -> (i32, i32) {
    %c0_i32 = arith.constant 0 : i32
    %c0_i32_0 = arith.constant 0 : i32
    %c0_i32_1 = arith.constant 0 : i32
    return %c0_i32, %c0_i32_0 : i32, i32
  }
  func.func @transform_7(%arg0: i32) -> (i32, i32) {
    %c0_i32 = arith.constant 0 : i32
    %c0_i32_0 = arith.constant 0 : i32
    %c0_i32_1 = arith.constant 0 : i32
    return %c0_i32, %c0_i32_0 : i32, i32
  }
  func.func @transform_8(%arg0: i32) -> (i32, i32) {
    %c0_i32 = arith.constant 0 : i32
    %c0_i32_0 = arith.constant 0 : i32
    %c0_i32_1 = arith.constant 0 : i32
    return %c0_i32, %c0_i32_0 : i32, i32
  }
  func.func @transform_9(%arg0: i32) -> (i32, i32) {
    %c0_i32 = arith.constant 0 : i32
    %c0_i32_0 = arith.constant 0 : i32
    %c0_i32_1 = arith.constant 0 : i32
    return %c0_i32, %c0_i32_0 : i32, i32
  }
  func.func @transform_10(%arg0: i32) -> (i32, i32) {
    %c0_i32 = arith.constant 0 : i32
    %c0_i32_0 = arith.constant 0 : i32
    %c0_i32_1 = arith.constant 0 : i32
    return %c0_i32, %c0_i32_0 : i32, i32
  }
  func.func @transform_11(%arg0: i32) -> (i32, i32, i32) {
    %c0_i32 = arith.constant 0 : i32
    %c0_i32_0 = arith.constant 0 : i32
    %c0_i32_1 = arith.constant 0 : i32
    return %arg0, %c0_i32, %c0_i32_0 : i32, i32, i32
  }
}

</mosaic_0001>

<bundles_post_ra>
// kernel: tpu_custom_call.1
= control target key start
LH: loop header
LB: loop body
LE: loop exit
PB: predicated region body
PF: predicated region fallthrough
CT: control target
= control target key end

     0   :  { %16 = vsyncpa [#allocation3], 0  ;;  %s715_s0 = inlined_call_operand.vmem [shape: f32[8,256], index: 0, kind: input, shape index: {}]   ;;  %s716_s1 = inlined_call_operand.vmem [shape: f32[8,16], index: 1, kind: input, shape index: {}]   ;;  %s717_s2 = inlined_call_operand.vmem [shape: f32[8,1], index: 2, kind: input, shape index: {}]   ;;  %s718_s3 = inlined_call_operand.vmem [shape: f32[8,16], index: 3, kind: input, shape index: {}]   ;;  %s719_s4 = inlined_call_operand.vmem [shape: f32[8,1], index: 4, kind: input, shape index: {}]   ;;  %s720_s5 = inlined_call_operand.vmem [shape: f32[8,8], index: 5, kind: input, shape index: {}]   ;;  %s721_s6 = inlined_call_operand.vmem [shape: f32[8,1], index: 6, kind: input, shape index: {}]   ;;  %s722_s7 = inlined_call_operand.vmem [shape: f32[8,16], index: 7, kind: input, shape index: {}]   ;;  %s723_s8 = inlined_call_operand.vmem [shape: f32[8,1], index: 8, kind: input, shape index: {}]   ;;  %s724_s9 = inlined_call_operand.hbm [shape: f32[8,16], index: 9, kind: input, shape index: {}]   ;;  %s725_s10 = inlined_call_operand.vmem [shape: f32[8,1], index: 10, kind: input, shape index: {}]   ;;  %s726_s11 = inlined_call_operand.hbm [shape: f32[2,8,128], index: 11, kind: output, shape index: {}]  }
   0x1   :  { %17 = vsyncpa [#allocation4], 0  ;;  %s41_s19 = sshll.u32 %s724_s9, 4  ;;  %s537_s20 = smov [#allocation2]   ;;  %s42_s19 = int_to_ptr.hbm [resolvable:$true] %s41_s19 }
   0x2   :  { %s43_s21 = sshll.u32 %s537_s20, 4  ;;  %s44_s21 = int_to_ptr.vmem [resolvable:$true] %s43_s21 }
   0x3   :  { %46 = dma.hbm_to_vmem [thread:$0]  %s42_s19, 128, %s44_s21, [#allocation3]  }
   0x4   :  { %533 = dma.done.wait [#allocation3], 128  }
   0x5   :  { %534 = vsyncadd [#allocation3], 4294967168  ;;  %v84_v0 = vld [vmem:[%s715_s0] sm:$0xff]  ;;  %v85_v1 = vld [vmem:[%s715_s0 + $0x8] sm:$0xff]  ;;  %s538_s26 = smov 1   ;;  %v539_v3 = vmov 0   ;;  %v53_v4 = vlaneseq }
   0x6   :  { %86 = vrot.lane.b32.xlu0 %v84_v0, %s538_s26  ;;  %144 = vmatpush.msra.mxu1 %v85_v1  ;;  %v100_v2 = vld [vmem:[%s717_s2] sm:$0xff]  ;;  %vm106_vm3 = vcmask 130048   ;;  %vm219_vm4 = vcmask 64512   ;;  %vm396_vm8 = vcmask 31744   ;;  %vm400_vm9 = vcmask 64544   ;;  %s444_s20 = sshll.u32 %s726_s11, 4  ;;  %s445_s20 = int_to_ptr.hbm [resolvable:$true] %s444_s20 }
   0x7   :  { %124 = vmatpush.msra.mxu0 %v84_v0  ;;  %482 = vset.pattern.permute.xlu1 %v539_v3  ;;  %v618_v5 = vand.u32 127, %v53_v4  ;;  %v99_v11 = vld [vmem:[%s716_s1] sm:$0xff]  ;;  %vm408_vm10 = vcmask 130144   ;;  %vm404_vm11 = vcmask 97344   ;;  %vm412_vm12 = vcmask 7168   ;;  %s542_s21 = smov 128  }
   0x8   :  { %484 = vset.pattern.permute.xlu0 %v539_v3  ;;  %103 = vperm.xlu1 %482, %v100_v2   ;;  %v212_v21 = vld [vmem:[%s720_s5] sm:$0xff]  ;;  %vm416_vm13 = vcmask 23552   ;;  %vm414_vm14 = vcmask 15360   ;;  %s543_s22 = smov 8  }
   0x9   :  { %483 = vset.pattern.permute.xlu2 %v539_v3  ;;  %v621_v6 = vadd.s32 128, %v618_v5  ;;  %vm90_vm0 = vcmp.lt.s32.totalorder %v618_v5, 1  ;;  %vm80_vm1 = vcmp.ge.s32.totalorder %v618_v5, 1  ;;  %v213_v22 = vld [vmem:[%s721_s6] sm:$0xff]  ;;  %vm271_vm5 = vcmp.lt.s32.totalorder %v618_v5, 2 }
   0xa   :  { %v161_v23 = vld [vmem:[%s719_s4] sm:$0xff]  ;;  %vm82_vm6 = vcmp.ge.s32.totalorder %v618_v5, 2 }
   0xb   :  { %v67_v8 = vand.u32 127, %v621_v6  ;;  %v160_v26 = vld [vmem:[%s718_s3] sm:$0xff]  ;;  %s540_s3 = smov 2  }
   0xc   :  { %v281_v45 = vld [vmem:[%s723_s8] sm:$0xff] }
   0xd   :  { %vm628_vm2 = vcmp.ge.s32.totalorder %v67_v8, 1  ;;  %v341_v46 = vld [vmem:[%s725_s10] sm:$0xff]  ;;  %vm679_vm7 = vcmp.ge.s32.totalorder %v67_v8, 2 }
   0xe   :  { %88 = vrot.lane.b32.xlu0 %v85_v1, %s538_s26  ;;  %v280_v50 = vld [vmem:[%s722_s7] sm:$0xff]  ;;  %s541_s7 = smov [#allocation5]  }
   0xf   :  { %v340_v62 = vld [vmem:[#allocation2] sm:$0xff]  ;;  %s442_s10 = sshll.u32 %s541_s7, 4  ;;  %s443_s10 = int_to_ptr.vmem [resolvable:$true] %s442_s10 }
  0x16   :  { %216 = vperm.xlu0 %484, %v213_v22  }
  0x78   :  { %v87_v7 = vpop.permute.xlu0 %86 }
  0x7a   :  { %v104_v14 = vpop.permute.xlu1 %103 }
  0x80   :  { %v89_v10 = vpop.permute.xlu0 %88 }
  0x81   :  { %v92_v12 = vsel %vm90_vm0, %v89_v10, %v87_v7  ;;  %v91_v13 = vsel %vm90_vm0, %v87_v7, %v89_v10 }
  0x82   :  { %457 = vmatpush.msk.msra.mxu0 %vm80_vm1, %v92_v12  ;;  %459 = vmatpush.msk.msra.mxu1 %vm628_vm2, %v91_v13 }
  0x83   :  { %458 = vmatmul.msk.f32.vlgmr.msra.gmra.mxu0 %vm106_vm3, %v99_v11  ;;  %460 = vmatmul.msk.f32.vlgmr.msra.gmra.mxu1 %vm106_vm3, %v99_v11 }
  0x84   :  { %238 = vmatpush.msrb.mxu0 %v84_v0  ;;  %258 = vmatpush.msrb.mxu1 %v85_v1 }
  0x88   :  { %v217_v31 = vpop.permute.xlu0 %216 }
  0x8b   :  { %465 = vmatmul.msk.f32.vlgmr.msrb.gmra.mxu0 %vm219_vm4, %v212_v21  ;;  %466 = vmatmul.msk.f32.vlgmr.msrb.gmra.mxu1 %vm219_vm4, %v212_v21 }
 0x100   :  { %v127_v15 = vpop.f32.mrf.mxu0  ;;  %v147_v16 = vpop.f32.mrf.mxu1 }
 0x101   :  { %v128_v17 = vadd.f32 %v127_v15, %v104_v14  ;;  %v148_v18 = vadd.f32 %v147_v16, %v104_v14 }
 0x103   :  { %v150_v19 = vmax.f32 %v128_v17, 0.0  ;;  %v151_v20 = vmax.f32 %v148_v18, 0.0 }
 0x105   :  { %154 = vrot.lane.b32.xlu2 %v151_v20, %s538_s26  ;;  %204 = vmatpush.msra.mxu3 %v151_v20 }
 0x106   :  { %152 = vrot.lane.b32.xlu1 %v150_v19, %s538_s26  ;;  %184 = vmatpush.msra.mxu2 %v150_v19 }
 0x108   :  { %v260_v30 = vpop.f32.mrf.mxu1  ;;  %v240_v32 = vpop.f32.mrf.mxu0 }
 0x109   :  { %v261_v37 = vadd.f32 %v260_v30, %v217_v31  ;;  %v241_v38 = vadd.f32 %v240_v32, %v217_v31 }
 0x10d   :  { %164 = vperm.xlu2 %483, %v161_v23  }
 0x15f   :  { %v155_v24 = vpop.permute.xlu2 %154 }
 0x167   :  { %v165_v29 = vpop.permute.xlu2 %164 }
 0x178   :  { %v153_v25 = vpop.permute.xlu1 %152 }
 0x179   :  { %v157_v27 = vsel %vm90_vm0, %v155_v24, %v153_v25  ;;  %v156_v28 = vsel %vm90_vm0, %v153_v25, %v155_v24 }
 0x17a   :  { %461 = vmatpush.msk.msra.mxu2 %vm80_vm1, %v157_v27  ;;  %463 = vmatpush.msk.msra.mxu3 %vm628_vm2, %v156_v28 }
 0x17b   :  { %462 = vmatmul.msk.f32.vlgmr.msra.gmra.mxu2 %vm106_vm3, %v160_v26  ;;  %464 = vmatmul.msk.f32.vlgmr.msra.gmra.mxu3 %vm106_vm3, %v160_v26 }
 0x1fe   :  { %v187_v33 = vpop.f32.mrf.mxu2  ;;  %v207_v34 = vpop.f32.mrf.mxu3 }
 0x1ff   :  { %v188_v35 = vadd.f32 %v187_v33, %v165_v29  ;;  %v208_v36 = vadd.f32 %v207_v34, %v165_v29 }
 0x201   :  { %v210_v39 = vmax.f32 %v188_v35, 0.0  ;;  %v211_v40 = vmax.f32 %v208_v36, 0.0 }
 0x203   :  { %v264_v41 = vadd.f32 %v261_v37, %v211_v40  ;;  %v263_v42 = vadd.f32 %v241_v38, %v210_v39 }
 0x205   :  { %v265_v43 = vmax.f32 %v263_v42, 0.0  ;;  %v266_v44 = vmax.f32 %v264_v41, 0.0 }
 0x207   :  { %269 = vrot.lane.b32.xlu2 %v266_v44, %s540_s3  ;;  %324 = vmatpush.msrb.mxu3 %v266_v44 }
 0x208   :  { %267 = vrot.lane.b32.xlu1 %v265_v43, %s540_s3  ;;  %304 = vmatpush.msrb.mxu2 %v265_v43 }
 0x210   :  { %284 = vperm.xlu1 %482, %v281_v45  }
 0x218   :  { %344 = vperm.xlu1 %482, %v341_v46  }
 0x261   :  { %v270_v48 = vpop.permute.xlu2 %269 }
 0x27a   :  { %v268_v49 = vpop.permute.xlu1 %267 }
 0x27b   :  { %v273_v51 = vsel %vm271_vm5, %v270_v48, %v268_v49  ;;  %v272_v52 = vsel %vm271_vm5, %v268_v49, %v270_v48 }
 0x27c   :  { %467 = vmatpush.msk.msrb.mxu2 %vm82_vm6, %v273_v51  ;;  %469 = vmatpush.msk.msrb.mxu3 %vm679_vm7, %v272_v52 }
 0x27d   :  { %468 = vmatmul.msk.f32.vlgmr.msrb.gmra.mxu2 %vm106_vm3, %v280_v50  ;;  %470 = vmatmul.msk.f32.vlgmr.msrb.gmra.mxu3 %vm106_vm3, %v280_v50 }
 0x282   :  { %v285_v53 = vpop.permute.xlu1 %284 }
 0x28a   :  { %v345_v1 = vpop.permute.xlu1 %344 }
 0x300   :  { %v307_v54 = vpop.f32.mrf.mxu2  ;;  %v327_v55 = vpop.f32.mrf.mxu3 }
 0x301   :  { %v308_v56 = vadd.f32 %v307_v54, %v285_v53  ;;  %v328_v57 = vadd.f32 %v327_v55, %v285_v53 }
 0x303   :  { %v330_v58 = vmax.f32 %v308_v56, 0.0  ;;  %v331_v59 = vmax.f32 %v328_v57, 0.0 }
 0x305   :  { %334 = vrot.lane.b32.xlu0 %v331_v59, %s540_s3  ;;  %384 = vmatpush.msra.mxu1 %v331_v59 }
 0x306   :  { %332 = vrot.lane.b32.xlu2 %v330_v58, %s540_s3  ;;  %364 = vmatpush.msra.mxu0 %v330_v58 }
 0x360   :  { %v333_v60 = vpop.permute.xlu2 %332 }
 0x377   :  { %v335_v61 = vpop.permute.xlu0 %334 }
 0x378   :  { %v336_v63 = vsel %vm271_vm5, %v333_v60, %v335_v61  ;;  %v337_v0 = vsel %vm271_vm5, %v335_v61, %v333_v60 }
 0x379   :  { %471 = vmatpush.msk.msra.mxu0 %vm82_vm6, %v337_v0  ;;  %473 = vmatpush.msk.msra.mxu1 %vm679_vm7, %v336_v63 }
 0x37a   :  { %472 = vmatmul.msk.f32.vlgmr.msra.gmra.mxu0 %vm106_vm3, %v340_v62  ;;  %474 = vmatmul.msk.f32.vlgmr.msra.gmra.mxu1 %vm106_vm3, %v340_v62 }
 0x3f7   :  { %v367_v2 = vpop.f32.mrf.mxu0  ;;  %v387_v3 = vpop.f32.mrf.mxu1 }
 0x3f8   :  { %v368_v4 = vadd.f32 %v367_v2, %v345_v1  ;;  %v388_v6 = vadd.f32 %v387_v3, %v345_v1 }
 0x3fa   :  { %v390_v7 = vmax.f32 %v368_v4, 0.0  ;;  %v391_v8 = vmax.f32 %v388_v6, 0.0 }
 0x3fc   :  { %v392_v9 = vadd.f32 %v390_v7, %v265_v43  ;;  %v393_v10 = vadd.f32 %v391_v8, %v266_v44 }
 0x3fe   :  { %v394_v5 = vmax.f32 %v392_v9, 0.0  ;;  %v395_v11 = vmax.f32 %v393_v10, 0.0 }
 0x400   :  { %v420_v12 = vsel %vm396_vm8, %v395_v11, -inf  ;;  %v401_v13 = vsel %vm400_vm9, %v394_v5, -inf  ;;  %v397_v14 = vsel %vm396_vm8, %v394_v5, -inf  ;;  %v409_v15 = vsel %vm408_vm10, %v394_v5, -inf }
 0x401   :  { %421 = vmax.xlane.f32.xlu1 %v420_v12  ;;  %402 = vmax.xlane.f32.xlu0 %v401_v13  ;;  %v426_v16 = vsel %vm404_vm11, %v395_v11, -inf  ;;  %v423_v17 = vsel %vm400_vm9, %v395_v11, -inf  ;;  %v405_v18 = vsel %vm404_vm11, %v394_v5, -inf  ;;  %v429_v19 = vsel %vm408_vm10, %v395_v11, -inf }
 0x402   :  { %398 = vmax.xlane.f32.xlu2 %v397_v14 }
 0x409   :  { %410 = vmax.xlane.f32.xlu1 %v409_v15  ;;  %427 = vmax.xlane.f32.xlu0 %v426_v16 }
 0x40a   :  { %424 = vmax.xlane.f32.xlu2 %v423_v17 }
 0x412   :  { %406 = vmax.xlane.f32.xlu2 %v405_v18 }
 0x41a   :  { %430 = vmax.xlane.f32.xlu2 %v429_v19 }
 0x474   :  { %v422_v21 = vpop.xlane.xlu1 %421  ;;  %v403_v23 = vpop.xlane.xlu0 %402 }
 0x475   :  { %v399_v20 = vpop.xlane.xlu2 %398 }
 0x476   :  { %v413_v24 = vsel %vm412_vm12, %v399_v20, %v403_v23 }
 0x47c   :  { %v411_v26 = vpop.xlane.xlu1 %410  ;;  %v428_v30 = vpop.xlane.xlu0 %427 }
 0x47d   :  { %v425_v22 = vpop.xlane.xlu2 %424 }
 0x47e   :  { %v432_v31 = vsel %vm412_vm12, %v422_v21, %v425_v22 }
 0x47f   :  { %v433_v32 = vsel %vm414_vm14, %v432_v31, %v428_v30 }
 0x485   :  { %v407_v25 = vpop.xlane.xlu2 %406 }
 0x486   :  { %v415_v27 = vsel %vm414_vm14, %v413_v24, %v407_v25 }
 0x487   :  { %v417_v28 = vsel %vm416_vm13, %v415_v27, %v411_v26 }
 0x488   :  { %v418_v29 = vsel %vm396_vm8, %v417_v28, 0.0 }
 0x489   :  { %419 = vst [vmem:[#allocation5] sm:$0xff] %v418_v29 }
 0x48d   :  { %v431_v33 = vpop.xlane.xlu2 %430 }
 0x48e   :  { %v434_v34 = vsel %vm416_vm13, %v433_v32, %v431_v33 }
 0x48f   :  { %v435_v35 = vsel %vm396_vm8, %v434_v34, 0.0 }
 0x490   :  { %437 = vst [vmem:[#allocation5 + $0x8] sm:$0xff] %v435_v35 }
 0x491   :  { %450 = dma.vmem_to_hbm [thread:$0]  %s443_s10, 256, %s445_s20, [#allocation4], %s542_s21, %s542_s21, %s543_s22  }
 0x492   :  { %535 = dma.done.wait [#allocation4], 256  }
 0x493   :  { %536 = vsyncadd [#allocation4], 4294967040 }
 0x494   :  { %455 = vsyncpa [#allocation3], 1 }
 0x495   :  { %456 = vsyncpa [#allocation4], 1 }

</bundles_post_ra>
